<compile_context>
chip_gen: v7x
topology: tpu7x:2x2x1
jax: 0.10.0
libtpu: 0.0.40
codegen_flags: <defaults>
</compile_context>

<pallas_src>
import functools

import jax
import jax.numpy as jnp
from jax.experimental import pallas as pl
from jax.experimental.pallas import tpu as pltpu

EPS = 1e-5
_NUM_ACC = 4  # independent conv accumulator chains


def diffusion_block_kernel(x_ref, bias_ref, wcol_ref, o_ref,
                           *, n_batch, n_chan, width, kh, kw):
    # x_ref:    (C*N, H*W) float32, channel-major rows (r = co*N + b), lane-dense
    # bias_ref: (C*N, 1)   effective bias (conv bias + conv(beta)) per row
    # wcol_ref: (C*N, KH*KW*C) folded conv-weight columns (gamma already folded in)
    # o_ref:    (C*N, H*W) full-grid conv output (valid window sliced by caller)
    nc, hw = x_ref.shape
    c = n_chan
    n = n_batch
    x = x_ref[...]

    # ---- BatchNorm2d, training mode: single-pass per-channel batch stats ----------
    # sum(x) and sum(x*x) are independent (no mean -> xc -> sumsq chain); biased var.
    inv_cnt = 1.0 / float(n * hw)
    row_sum = jnp.sum(x, axis=1, keepdims=True)          # (NC, 1) lane reduce
    row_sq = jnp.sum(x * x, axis=1, keepdims=True)       # (NC, 1) lane reduce
    ch_sum = row_sum
    ch_sq = row_sq
    if n > 1:
        # Combine batch replicas: circular shift within each contiguous group of N rows,
        # built from two full-slab rolls + a static-mask select (rows of one channel are
        # contiguous in channel-major layout).
        b_idx = jax.lax.broadcasted_iota(jnp.int32, (nc, 1), 0) % n
        for j in range(1, n):
            take_hi = b_idx >= j
            hi_s = pltpu.roll(row_sum, j, axis=0)
            lo_s = pltpu.roll(row_sum, (j - n) % nc, axis=0)
            hi_q = pltpu.roll(row_sq, j, axis=0)
            lo_q = pltpu.roll(row_sq, (j - n) % nc, axis=0)
            ch_sum = ch_sum + jnp.where(take_hi, hi_s, lo_s)
            ch_sq = ch_sq + jnp.where(take_hi, hi_q, lo_q)
    mean = ch_sum * inv_cnt
    var = ch_sq * inv_cnt - mean * mean                   # biased variance (train mode)
    scale = jax.lax.rsqrt(var + EPS)
    # gamma is folded into wcol, beta into bias_ref -> normalized slab is just (x-mean)*scale.
    xn = (x - mean) * scale
    # TODO(synk): PyTorch train-mode BatchNorm also updates running_mean/running_var; this
    # forward-only kernel does not carry that side effect.

    # ---- Conv2d(valid, stride=1): lane roll per tap + sublane roll per channel offset ----
    wc = wcol_ref[...]                                    # (NC, KH*KW*C), < 1 vreg wide
    n_terms = kh * kw * c
    num_acc = min(_NUM_ACC, n_terms)
    accs = [jnp.zeros((nc, hw), jnp.float32) for _ in range(num_acc)]
    term_idx = 0
    for dy in range(kh):
        for dx in range(kw):
            s = dy * width + dx
            # xs[r, l] = xn[r, l + s]; wrap-around only lands on lanes outside the
            # valid (Ho, Wo) window, which the wrapper slices away.
            xs = pltpu.roll(xn, (hw - s) % hw, axis=1) if s else xn
            t = dy * kw + dx
            for j in range(c):
                # src[r, :] = xn row of input channel (co + j) % C, same batch.
                shift = (nc - j * n) % nc
                src = pltpu.roll(xs, shift, axis=0) if shift else xs
                col = wc[:, t * c + j: t * c + j + 1]     # (NC, 1) folded weights
                a = term_idx % num_acc
                accs[a] = accs[a] + col * src
                term_idx += 1
    # Tree-sum the independent accumulators.
    while len(accs) > 1:
        nxt = [accs[i] + accs[i + 1] for i in range(0, len(accs) - 1, 2)]
        if len(accs) % 2:
            nxt.append(accs[-1])
        accs = nxt

    o_ref[...] = jnp.tanh(accs[0] + bias_ref[...])


def fold_diffusion_params(conv_w, conv_b, gamma, beta, n_batch):
    """One-time parameter preprocessing (module init / outside the per-step path).

    Returns:
      wcol:      (N*C, KH*KW*C) f32, wcol[r, t*C + j] = w[co, (co+j)%C, dy, dx] * gamma[(co+j)%C]
                 with r = co*N + b (channel-major rows), t = dy*KW + dx.
      bias_rows: (N*C, 1) f32, conv_b[co] + sum_{ci,dy,dx} w[co,ci,dy,dx] * beta[ci].
    """
    cout, cin, kh, kw = conv_w.shape
    assert cout == cin, "DiffusionBlock uses C_out == C_in"
    c = cout
    nc = n_batch * c
    w = conv_w.astype(jnp.float32)
    w_eff = w * gamma.astype(jnp.float32)[None, :, None, None]          # fold gamma (per ci)
    bias_eff = conv_b.astype(jnp.float32) + jnp.einsum(
        "oikl,i->o", w, beta.astype(jnp.float32))                        # fold beta
    co = jnp.arange(nc) // n_batch                                       # (NC,)
    j = jnp.arange(c)                                                    # (C,)
    ci = (co[:, None] + j[None, :]) % c                                  # (NC, C)
    w_flat = w_eff.reshape(c, c, kh * kw)                                # (Cout, Cin, T)
    cols = w_flat[co[:, None], ci, :]                                    # (NC, C, T)
    wcol = jnp.transpose(cols, (0, 2, 1)).reshape(nc, kh * kw * c)       # [r, t*C + j]
    bias_rows = jnp.repeat(bias_eff, n_batch).reshape(nc, 1)
    return wcol, bias_rows


@functools.partial(jax.jit, static_argnames=("kh", "kw"))
def diffusion_block_apply(x_nchw, wcol, bias_rows, *, kh, kw):
    """Per-forward path: reshape x to the channel-major slab, run the kernel, slice."""
    n, c, h, w = x_nchw.shape
    ho, wo = h - kh + 1, w - kw + 1
    nc, hw = n * c, h * w
    assert nc % 8 == 0, "N*C must be a multiple of 8 sublanes for the whole-slab kernel"
    assert hw % 128 == 0, "H*W must be a multiple of 128 lanes for the whole-slab kernel"

    # Channel-major rows (channel outer, batch inner): tiny 8 KiB row-axis transpose.
    x2 = x_nchw.astype(jnp.float32).transpose(1, 0, 2, 3).reshape(nc, hw)

    kernel = functools.partial(
        diffusion_block_kernel, n_batch=n, n_chan=c, width=w, kh=kh, kw=kw)

    # Single program: the whole problem is ~8 KiB and BatchNorm statistics couple every
    # row; a grid would only add per-step overhead.  (For stacked independent blocks,
    # add a leading "parallel" grid axis — ~2x on v7x's 2 TCs, harmless elsewhere.)
    out_full = pl.pallas_call(
        kernel,
        out_shape=jax.ShapeDtypeStruct((nc, hw), jnp.float32),
        in_specs=[pl.BlockSpec(memory_space=pltpu.MemorySpace.VMEM)] * 3,
        out_specs=pl.BlockSpec(memory_space=pltpu.MemorySpace.VMEM),
    )(x2, bias_rows, wcol)

    # Valid conv window, back to NCHW.
    return out_full.reshape(c, n, h, w)[:, :, :ho, :wo].transpose(1, 0, 2, 3)


def _reference(x_nchw, conv_w_oihw, conv_b, gamma, beta):
    # Pure-JAX reference for correctness check (not part of the kernel path).
    mean = jnp.mean(x_nchw, axis=(0, 2, 3), keepdims=True)
    var = jnp.mean((x_nchw - mean) ** 2, axis=(0, 2, 3), keepdims=True)
    xn = (x_nchw - mean) * jax.lax.rsqrt(var + EPS)
    xn = xn * gamma.reshape(1, -1, 1, 1) + beta.reshape(1, -1, 1, 1)
    y = jax.lax.conv_general_dilated(
        xn, conv_w_oihw, window_strides=(1, 1), padding="VALID",
        dimension_numbers=("NCHW", "OIHW", "NCHW"))
    return jnp.tanh(y + conv_b.reshape(1, -1, 1, 1))


if __name__ == "__main__":
    # Module config: DiffusionBlock(img_size=16, in_channels=4, kernel=3), batch=2.
    img_size, in_channels, kernel_size, batch = 16, 4, 3, 2

    key = jax.random.PRNGKey(0)
    k_x, k_w, k_b = jax.random.split(key, 3)

    x = jax.random.normal(k_x, (batch, in_channels, img_size, img_size), dtype=jnp.float32)

    # Deterministic parameter init (shapes follow nn.Conv2d / nn.BatchNorm2d).
    fan_in = in_channels * kernel_size * kernel_size
    bound = 1.0 / float(fan_in) ** 0.5
    conv_w = jax.random.uniform(k_w, (in_channels, in_channels, kernel_size, kernel_size),
                                minval=-bound, maxval=bound, dtype=jnp.float32)
    conv_b = jax.random.uniform(k_b, (in_channels,),
                                minval=-bound, maxval=bound, dtype=jnp.float32)
    gamma = jnp.ones((in_channels,), dtype=jnp.float32)   # BatchNorm weight default
    beta = jnp.zeros((in_channels,), dtype=jnp.float32)   # BatchNorm bias default

    # One-time parameter folding (hoisted out of the per-forward path).
    wcol, bias_rows = fold_diffusion_params(conv_w, conv_b, gamma, beta, batch)
    wcol = jax.block_until_ready(wcol)
    bias_rows = jax.block_until_ready(bias_rows)

    out = diffusion_block_apply(x, wcol, bias_rows, kh=kernel_size, kw=kernel_size)
    out = jax.block_until_ready(out)

    ref = _reference(x, conv_w, conv_b, gamma, beta)
    assert out.shape == (batch, in_channels,
                         img_size - kernel_size + 1, img_size - kernel_size + 1)
    assert jnp.allclose(out, ref, atol=1e-5, rtol=1e-5), "mismatch vs reference"

    print("KERNEL_OK")
</pallas_src>

<mosaic_0001>
module attributes {stable_mosaic.version = 11 : i64} {
  func.func @diffusion_block_kernel(%arg0: memref<8x256xf32, #tpu.memory_space<vmem>>, %arg1: memref<8x1xf32, #tpu.memory_space<vmem>>, %arg2: memref<8x36xf32, #tpu.memory_space<vmem>>, %arg3: memref<8x256xf32, #tpu.memory_space<vmem>>) attributes {dimension_semantics = [], scalar_prefetch = 0 : i64, scratch_operands = 0 : i64, tpu.core_type = #tpu.core_type<tc>} {
    %c0 = arith.constant 0 : index
    %c0_0 = arith.constant 0 : index
    %0 = vector.load %arg0[%c0, %c0_0] : memref<8x256xf32, #tpu.memory_space<vmem>>, vector<8x256xf32>
    %cst = arith.constant dense<0.000000e+00> : vector<8xf32>
    %1 = vector.multi_reduction <add>, %0, %cst [1] : vector<8x256xf32> to vector<8xf32>
    %2 = vector.shape_cast %1 : vector<8xf32> to vector<8x1xf32>
    %3 = arith.mulf %0, %0 : vector<8x256xf32>
    %cst_1 = arith.constant dense<0.000000e+00> : vector<8xf32>
    %4 = vector.multi_reduction <add>, %3, %cst_1 [1] : vector<8x256xf32> to vector<8xf32>
    %5 = vector.shape_cast %4 : vector<8xf32> to vector<8x1xf32>
    %6 = tpu.iota {dimensions = array<i32: 0>} : vector<8x1xi32>
    %c2_i32 = arith.constant 2 : i32
    %c0_i32 = arith.constant 0 : i32
    %7 = arith.cmpi eq, %c2_i32, %c0_i32 : i32
    %c1_i32 = arith.constant 1 : i32
    %8 = arith.select %7, %c1_i32, %c2_i32 : i32
    %9 = vector.broadcast %8 : i32 to vector<8x1xi32>
    %10 = arith.remsi %6, %9 : vector<8x1xi32>
    %c0_i32_2 = arith.constant 0 : i32
    %11 = vector.broadcast %c0_i32_2 : i32 to vector<8x1xi32>
    %12 = arith.cmpi ne, %10, %11 : vector<8x1xi32>
    %c0_i32_3 = arith.constant 0 : i32
    %13 = vector.broadcast %c0_i32_3 : i32 to vector<8x1xi32>
    %14 = arith.cmpi slt, %10, %13 : vector<8x1xi32>
    %c0_i32_4 = arith.constant 0 : i32
    %15 = arith.cmpi slt, %8, %c0_i32_4 : i32
    %16 = vector.broadcast %15 : i1 to vector<8x1xi1>
    %17 = vector.broadcast %16 : vector<8x1xi1> to vector<8x1xi1>
    %18 = arith.xori %14, %17 : vector<8x1xi1>
    %19 = arith.andi %18, %12 : vector<8x1xi1>
    %20 = vector.broadcast %8 : i32 to vector<8x1xi32>
    %21 = arith.addi %10, %20 : vector<8x1xi32>
    %22 = arith.select %19, %21, %10 : vector<8x1xi1>, vector<8x1xi32>
    %c1_i32_5 = arith.constant 1 : i32
    %23 = vector.broadcast %c1_i32_5 : i32 to vector<8x1xi32>
    %24 = arith.cmpi sge, %22, %23 : vector<8x1xi32>
    %c1_i32_6 = arith.constant 1 : i32
    %25 = tpu.dynamic_rotate %2 by %c1_i32_6 dim 0 : vector<8x1xf32>, i32 -> vector<8x1xf32>
    %c7_i32 = arith.constant 7 : i32
    %26 = tpu.dynamic_rotate %2 by %c7_i32 dim 0 : vector<8x1xf32>, i32 -> vector<8x1xf32>
    %c1_i32_7 = arith.constant 1 : i32
    %27 = tpu.dynamic_rotate %5 by %c1_i32_7 dim 0 : vector<8x1xf32>, i32 -> vector<8x1xf32>
    %c7_i32_8 = arith.constant 7 : i32
    %28 = tpu.dynamic_rotate %5 by %c7_i32_8 dim 0 : vector<8x1xf32>, i32 -> vector<8x1xf32>
    %29 = arith.select %24, %25, %26 : vector<8x1xi1>, vector<8x1xf32>
    %30 = arith.addf %2, %29 : vector<8x1xf32>
    %31 = arith.select %24, %27, %28 : vector<8x1xi1>, vector<8x1xf32>
    %32 = arith.addf %5, %31 : vector<8x1xf32>
    %cst_9 = arith.constant 0.001953125 : f32
    %33 = vector.broadcast %cst_9 : f32 to vector<8x1xf32>
    %34 = arith.mulf %30, %33 : vector<8x1xf32>
    %cst_10 = arith.constant 0.001953125 : f32
    %35 = vector.broadcast %cst_10 : f32 to vector<8x1xf32>
    %36 = arith.mulf %32, %35 : vector<8x1xf32>
    %37 = arith.mulf %34, %34 : vector<8x1xf32>
    %38 = arith.subf %36, %37 : vector<8x1xf32>
    %cst_11 = arith.constant 9.99999974E-6 : f32
    %39 = vector.broadcast %cst_11 : f32 to vector<8x1xf32>
    %40 = arith.addf %38, %39 : vector<8x1xf32>
    %41 = math.rsqrt %40 : vector<8x1xf32>
    %42 = vector.broadcast %34 : vector<8x1xf32> to vector<8x256xf32>
    %43 = arith.subf %0, %42 : vector<8x256xf32>
    %44 = vector.broadcast %41 : vector<8x1xf32> to vector<8x256xf32>
    %45 = arith.mulf %43, %44 : vector<8x256xf32>
    %c0_12 = arith.constant 0 : index
    %c0_13 = arith.constant 0 : index
    %46 = vector.load %arg2[%c0_12, %c0_13] : memref<8x36xf32, #tpu.memory_space<vmem>>, vector<8x36xf32>
    %cst_14 = arith.constant 0.000000e+00 : f32
    %47 = vector.broadcast %cst_14 : f32 to vector<8x256xf32>
    %cst_15 = arith.constant 0.000000e+00 : f32
    %48 = vector.broadcast %cst_15 : f32 to vector<8x256xf32>
    %cst_16 = arith.constant 0.000000e+00 : f32
    %49 = vector.broadcast %cst_16 : f32 to vector<8x256xf32>
    %cst_17 = arith.constant 0.000000e+00 : f32
    %50 = vector.broadcast %cst_17 : f32 to vector<8x256xf32>
    %51 = vector.extract_strided_slice %46 {offsets = [0, 0], sizes = [8, 1], strides = [1, 1]} : vector<8x36xf32> to vector<8x1xf32>
    %52 = vector.broadcast %51 : vector<8x1xf32> to vector<8x256xf32>
    %53 = arith.mulf %52, %45 : vector<8x256xf32>
    %54 = arith.addf %47, %53 : vector<8x256xf32>
    %c6_i32 = arith.constant 6 : i32
    %55 = tpu.dynamic_rotate %45 by %c6_i32 dim 0 : vector<8x256xf32>, i32 -> vector<8x256xf32>
    %56 = vector.extract_strided_slice %46 {offsets = [0, 1], sizes = [8, 1], strides = [1, 1]} : vector<8x36xf32> to vector<8x1xf32>
    %57 = vector.broadcast %56 : vector<8x1xf32> to vector<8x256xf32>
    %58 = arith.mulf %57, %55 : vector<8x256xf32>
    %59 = arith.addf %48, %58 : vector<8x256xf32>
    %c4_i32 = arith.constant 4 : i32
    %60 = tpu.dynamic_rotate %45 by %c4_i32 dim 0 : vector<8x256xf32>, i32 -> vector<8x256xf32>
    %61 = vector.extract_strided_slice %46 {offsets = [0, 2], sizes = [8, 1], strides = [1, 1]} : vector<8x36xf32> to vector<8x1xf32>
    %62 = vector.broadcast %61 : vector<8x1xf32> to vector<8x256xf32>
    %63 = arith.mulf %62, %60 : vector<8x256xf32>
    %64 = arith.addf %49, %63 : vector<8x256xf32>
    %c2_i32_18 = arith.constant 2 : i32
    %65 = tpu.dynamic_rotate %45 by %c2_i32_18 dim 0 : vector<8x256xf32>, i32 -> vector<8x256xf32>
    %66 = vector.extract_strided_slice %46 {offsets = [0, 3], sizes = [8, 1], strides = [1, 1]} : vector<8x36xf32> to vector<8x1xf32>
    %67 = vector.broadcast %66 : vector<8x1xf32> to vector<8x256xf32>
    %68 = arith.mulf %67, %65 : vector<8x256xf32>
    %69 = arith.addf %50, %68 : vector<8x256xf32>
    %c255_i32 = arith.constant 255 : i32
    %70 = tpu.dynamic_rotate %45 by %c255_i32 dim 1 : vector<8x256xf32>, i32 -> vector<8x256xf32>
    %71 = vector.extract_strided_slice %46 {offsets = [0, 4], sizes = [8, 1], strides = [1, 1]} : vector<8x36xf32> to vector<8x1xf32>
    %72 = vector.broadcast %71 : vector<8x1xf32> to vector<8x256xf32>
    %73 = arith.mulf %72, %70 : vector<8x256xf32>
    %74 = arith.addf %54, %73 : vector<8x256xf32>
    %c6_i32_19 = arith.constant 6 : i32
    %75 = tpu.dynamic_rotate %70 by %c6_i32_19 dim 0 : vector<8x256xf32>, i32 -> vector<8x256xf32>
    %76 = vector.extract_strided_slice %46 {offsets = [0, 5], sizes = [8, 1], strides = [1, 1]} : vector<8x36xf32> to vector<8x1xf32>
    %77 = vector.broadcast %76 : vector<8x1xf32> to vector<8x256xf32>
    %78 = arith.mulf %77, %75 : vector<8x256xf32>
    %79 = arith.addf %59, %78 : vector<8x256xf32>
    %c4_i32_20 = arith.constant 4 : i32
    %80 = tpu.dynamic_rotate %70 by %c4_i32_20 dim 0 : vector<8x256xf32>, i32 -> vector<8x256xf32>
    %81 = vector.extract_strided_slice %46 {offsets = [0, 6], sizes = [8, 1], strides = [1, 1]} : vector<8x36xf32> to vector<8x1xf32>
    %82 = vector.broadcast %81 : vector<8x1xf32> to vector<8x256xf32>
    %83 = arith.mulf %82, %80 : vector<8x256xf32>
    %84 = arith.addf %64, %83 : vector<8x256xf32>
    %c2_i32_21 = arith.constant 2 : i32
    %85 = tpu.dynamic_rotate %70 by %c2_i32_21 dim 0 : vector<8x256xf32>, i32 -> vector<8x256xf32>
    %86 = vector.extract_strided_slice %46 {offsets = [0, 7], sizes = [8, 1], strides = [1, 1]} : vector<8x36xf32> to vector<8x1xf32>
    %87 = vector.broadcast %86 : vector<8x1xf32> to vector<8x256xf32>
    %88 = arith.mulf %87, %85 : vector<8x256xf32>
    %89 = arith.addf %69, %88 : vector<8x256xf32>
    %c254_i32 = arith.constant 254 : i32
    %90 = tpu.dynamic_rotate %45 by %c254_i32 dim 1 : vector<8x256xf32>, i32 -> vector<8x256xf32>
    %91 = vector.extract_strided_slice %46 {offsets = [0, 8], sizes = [8, 1], strides = [1, 1]} : vector<8x36xf32> to vector<8x1xf32>
    %92 = vector.broadcast %91 : vector<8x1xf32> to vector<8x256xf32>
    %93 = arith.mulf %92, %90 : vector<8x256xf32>
    %94 = arith.addf %74, %93 : vector<8x256xf32>
    %c6_i32_22 = arith.constant 6 : i32
    %95 = tpu.dynamic_rotate %90 by %c6_i32_22 dim 0 : vector<8x256xf32>, i32 -> vector<8x256xf32>
    %96 = vector.extract_strided_slice %46 {offsets = [0, 9], sizes = [8, 1], strides = [1, 1]} : vector<8x36xf32> to vector<8x1xf32>
    %97 = vector.broadcast %96 : vector<8x1xf32> to vector<8x256xf32>
    %98 = arith.mulf %97, %95 : vector<8x256xf32>
    %99 = arith.addf %79, %98 : vector<8x256xf32>
    %c4_i32_23 = arith.constant 4 : i32
    %100 = tpu.dynamic_rotate %90 by %c4_i32_23 dim 0 : vector<8x256xf32>, i32 -> vector<8x256xf32>
    %101 = vector.extract_strided_slice %46 {offsets = [0, 10], sizes = [8, 1], strides = [1, 1]} : vector<8x36xf32> to vector<8x1xf32>
    %102 = vector.broadcast %101 : vector<8x1xf32> to vector<8x256xf32>
    %103 = arith.mulf %102, %100 : vector<8x256xf32>
    %104 = arith.addf %84, %103 : vector<8x256xf32>
    %c2_i32_24 = arith.constant 2 : i32
    %105 = tpu.dynamic_rotate %90 by %c2_i32_24 dim 0 : vector<8x256xf32>, i32 -> vector<8x256xf32>
    %106 = vector.extract_strided_slice %46 {offsets = [0, 11], sizes = [8, 1], strides = [1, 1]} : vector<8x36xf32> to vector<8x1xf32>
    %107 = vector.broadcast %106 : vector<8x1xf32> to vector<8x256xf32>
    %108 = arith.mulf %107, %105 : vector<8x256xf32>
    %109 = arith.addf %89, %108 : vector<8x256xf32>
    %c240_i32 = arith.constant 240 : i32
    %110 = tpu.dynamic_rotate %45 by %c240_i32 dim 1 : vector<8x256xf32>, i32 -> vector<8x256xf32>
    %111 = vector.extract_strided_slice %46 {offsets = [0, 12], sizes = [8, 1], strides = [1, 1]} : vector<8x36xf32> to vector<8x1xf32>
    %112 = vector.broadcast %111 : vector<8x1xf32> to vector<8x256xf32>
    %113 = arith.mulf %112, %110 : vector<8x256xf32>
    %114 = arith.addf %94, %113 : vector<8x256xf32>
    %c6_i32_25 = arith.constant 6 : i32
    %115 = tpu.dynamic_rotate %110 by %c6_i32_25 dim 0 : vector<8x256xf32>, i32 -> vector<8x256xf32>
    %116 = vector.extract_strided_slice %46 {offsets = [0, 13], sizes = [8, 1], strides = [1, 1]} : vector<8x36xf32> to vector<8x1xf32>
    %117 = vector.broadcast %116 : vector<8x1xf32> to vector<8x256xf32>
    %118 = arith.mulf %117, %115 : vector<8x256xf32>
    %119 = arith.addf %99, %118 : vector<8x256xf32>
    %c4_i32_26 = arith.constant 4 : i32
    %120 = tpu.dynamic_rotate %110 by %c4_i32_26 dim 0 : vector<8x256xf32>, i32 -> vector<8x256xf32>
    %121 = vector.extract_strided_slice %46 {offsets = [0, 14], sizes = [8, 1], strides = [1, 1]} : vector<8x36xf32> to vector<8x1xf32>
    %122 = vector.broadcast %121 : vector<8x1xf32> to vector<8x256xf32>
    %123 = arith.mulf %122, %120 : vector<8x256xf32>
    %124 = arith.addf %104, %123 : vector<8x256xf32>
    %c2_i32_27 = arith.constant 2 : i32
    %125 = tpu.dynamic_rotate %110 by %c2_i32_27 dim 0 : vector<8x256xf32>, i32 -> vector<8x256xf32>
    %126 = vector.extract_strided_slice %46 {offsets = [0, 15], sizes = [8, 1], strides = [1, 1]} : vector<8x36xf32> to vector<8x1xf32>
    %127 = vector.broadcast %126 : vector<8x1xf32> to vector<8x256xf32>
    %128 = arith.mulf %127, %125 : vector<8x256xf32>
    %129 = arith.addf %109, %128 : vector<8x256xf32>
    %c239_i32 = arith.constant 239 : i32
    %130 = tpu.dynamic_rotate %45 by %c239_i32 dim 1 : vector<8x256xf32>, i32 -> vector<8x256xf32>
    %131 = vector.extract_strided_slice %46 {offsets = [0, 16], sizes = [8, 1], strides = [1, 1]} : vector<8x36xf32> to vector<8x1xf32>
    %132 = vector.broadcast %131 : vector<8x1xf32> to vector<8x256xf32>
    %133 = arith.mulf %132, %130 : vector<8x256xf32>
    %134 = arith.addf %114, %133 : vector<8x256xf32>
    %c6_i32_28 = arith.constant 6 : i32
    %135 = tpu.dynamic_rotate %130 by %c6_i32_28 dim 0 : vector<8x256xf32>, i32 -> vector<8x256xf32>
    %136 = vector.extract_strided_slice %46 {offsets = [0, 17], sizes = [8, 1], strides = [1, 1]} : vector<8x36xf32> to vector<8x1xf32>
    %137 = vector.broadcast %136 : vector<8x1xf32> to vector<8x256xf32>
    %138 = arith.mulf %137, %135 : vector<8x256xf32>
    %139 = arith.addf %119, %138 : vector<8x256xf32>
    %c4_i32_29 = arith.constant 4 : i32
    %140 = tpu.dynamic_rotate %130 by %c4_i32_29 dim 0 : vector<8x256xf32>, i32 -> vector<8x256xf32>
    %141 = vector.extract_strided_slice %46 {offsets = [0, 18], sizes = [8, 1], strides = [1, 1]} : vector<8x36xf32> to vector<8x1xf32>
    %142 = vector.broadcast %141 : vector<8x1xf32> to vector<8x256xf32>
    %143 = arith.mulf %142, %140 : vector<8x256xf32>
    %144 = arith.addf %124, %143 : vector<8x256xf32>
    %c2_i32_30 = arith.constant 2 : i32
    %145 = tpu.dynamic_rotate %130 by %c2_i32_30 dim 0 : vector<8x256xf32>, i32 -> vector<8x256xf32>
    %146 = vector.extract_strided_slice %46 {offsets = [0, 19], sizes = [8, 1], strides = [1, 1]} : vector<8x36xf32> to vector<8x1xf32>
    %147 = vector.broadcast %146 : vector<8x1xf32> to vector<8x256xf32>
    %148 = arith.mulf %147, %145 : vector<8x256xf32>
    %149 = arith.addf %129, %148 : vector<8x256xf32>
    %c238_i32 = arith.constant 238 : i32
    %150 = tpu.dynamic_rotate %45 by %c238_i32 dim 1 : vector<8x256xf32>, i32 -> vector<8x256xf32>
    %151 = vector.extract_strided_slice %46 {offsets = [0, 20], sizes = [8, 1], strides = [1, 1]} : vector<8x36xf32> to vector<8x1xf32>
    %152 = vector.broadcast %151 : vector<8x1xf32> to vector<8x256xf32>
    %153 = arith.mulf %152, %150 : vector<8x256xf32>
    %154 = arith.addf %134, %153 : vector<8x256xf32>
    %c6_i32_31 = arith.constant 6 : i32
    %155 = tpu.dynamic_rotate %150 by %c6_i32_31 dim 0 : vector<8x256xf32>, i32 -> vector<8x256xf32>
    %156 = vector.extract_strided_slice %46 {offsets = [0, 21], sizes = [8, 1], strides = [1, 1]} : vector<8x36xf32> to vector<8x1xf32>
    %157 = vector.broadcast %156 : vector<8x1xf32> to vector<8x256xf32>
    %158 = arith.mulf %157, %155 : vector<8x256xf32>
    %159 = arith.addf %139, %158 : vector<8x256xf32>
    %c4_i32_32 = arith.constant 4 : i32
    %160 = tpu.dynamic_rotate %150 by %c4_i32_32 dim 0 : vector<8x256xf32>, i32 -> vector<8x256xf32>
    %161 = vector.extract_strided_slice %46 {offsets = [0, 22], sizes = [8, 1], strides = [1, 1]} : vector<8x36xf32> to vector<8x1xf32>
    %162 = vector.broadcast %161 : vector<8x1xf32> to vector<8x256xf32>
    %163 = arith.mulf %162, %160 : vector<8x256xf32>
    %164 = arith.addf %144, %163 : vector<8x256xf32>
    %c2_i32_33 = arith.constant 2 : i32
    %165 = tpu.dynamic_rotate %150 by %c2_i32_33 dim 0 : vector<8x256xf32>, i32 -> vector<8x256xf32>
    %166 = vector.extract_strided_slice %46 {offsets = [0, 23], sizes = [8, 1], strides = [1, 1]} : vector<8x36xf32> to vector<8x1xf32>
    %167 = vector.broadcast %166 : vector<8x1xf32> to vector<8x256xf32>
    %168 = arith.mulf %167, %165 : vector<8x256xf32>
    %169 = arith.addf %149, %168 : vector<8x256xf32>
    %c224_i32 = arith.constant 224 : i32
    %170 = tpu.dynamic_rotate %45 by %c224_i32 dim 1 : vector<8x256xf32>, i32 -> vector<8x256xf32>
    %171 = vector.extract_strided_slice %46 {offsets = [0, 24], sizes = [8, 1], strides = [1, 1]} : vector<8x36xf32> to vector<8x1xf32>
    %172 = vector.broadcast %171 : vector<8x1xf32> to vector<8x256xf32>
    %173 = arith.mulf %172, %170 : vector<8x256xf32>
    %174 = arith.addf %154, %173 : vector<8x256xf32>
    %c6_i32_34 = arith.constant 6 : i32
    %175 = tpu.dynamic_rotate %170 by %c6_i32_34 dim 0 : vector<8x256xf32>, i32 -> vector<8x256xf32>
    %176 = vector.extract_strided_slice %46 {offsets = [0, 25], sizes = [8, 1], strides = [1, 1]} : vector<8x36xf32> to vector<8x1xf32>
    %177 = vector.broadcast %176 : vector<8x1xf32> to vector<8x256xf32>
    %178 = arith.mulf %177, %175 : vector<8x256xf32>
    %179 = arith.addf %159, %178 : vector<8x256xf32>
    %c4_i32_35 = arith.constant 4 : i32
    %180 = tpu.dynamic_rotate %170 by %c4_i32_35 dim 0 : vector<8x256xf32>, i32 -> vector<8x256xf32>
    %181 = vector.extract_strided_slice %46 {offsets = [0, 26], sizes = [8, 1], strides = [1, 1]} : vector<8x36xf32> to vector<8x1xf32>
    %182 = vector.broadcast %181 : vector<8x1xf32> to vector<8x256xf32>
    %183 = arith.mulf %182, %180 : vector<8x256xf32>
    %184 = arith.addf %164, %183 : vector<8x256xf32>
    %c2_i32_36 = arith.constant 2 : i32
    %185 = tpu.dynamic_rotate %170 by %c2_i32_36 dim 0 : vector<8x256xf32>, i32 -> vector<8x256xf32>
    %186 = vector.extract_strided_slice %46 {offsets = [0, 27], sizes = [8, 1], strides = [1, 1]} : vector<8x36xf32> to vector<8x1xf32>
    %187 = vector.broadcast %186 : vector<8x1xf32> to vector<8x256xf32>
    %188 = arith.mulf %187, %185 : vector<8x256xf32>
    %189 = arith.addf %169, %188 : vector<8x256xf32>
    %c223_i32 = arith.constant 223 : i32
    %190 = tpu.dynamic_rotate %45 by %c223_i32 dim 1 : vector<8x256xf32>, i32 -> vector<8x256xf32>
    %191 = vector.extract_strided_slice %46 {offsets = [0, 28], sizes = [8, 1], strides = [1, 1]} : vector<8x36xf32> to vector<8x1xf32>
    %192 = vector.broadcast %191 : vector<8x1xf32> to vector<8x256xf32>
    %193 = arith.mulf %192, %190 : vector<8x256xf32>
    %194 = arith.addf %174, %193 : vector<8x256xf32>
    %c6_i32_37 = arith.constant 6 : i32
    %195 = tpu.dynamic_rotate %190 by %c6_i32_37 dim 0 : vector<8x256xf32>, i32 -> vector<8x256xf32>
    %196 = vector.extract_strided_slice %46 {offsets = [0, 29], sizes = [8, 1], strides = [1, 1]} : vector<8x36xf32> to vector<8x1xf32>
    %197 = vector.broadcast %196 : vector<8x1xf32> to vector<8x256xf32>
    %198 = arith.mulf %197, %195 : vector<8x256xf32>
    %199 = arith.addf %179, %198 : vector<8x256xf32>
    %c4_i32_38 = arith.constant 4 : i32
    %200 = tpu.dynamic_rotate %190 by %c4_i32_38 dim 0 : vector<8x256xf32>, i32 -> vector<8x256xf32>
    %201 = vector.extract_strided_slice %46 {offsets = [0, 30], sizes = [8, 1], strides = [1, 1]} : vector<8x36xf32> to vector<8x1xf32>
    %202 = vector.broadcast %201 : vector<8x1xf32> to vector<8x256xf32>
    %203 = arith.mulf %202, %200 : vector<8x256xf32>
    %204 = arith.addf %184, %203 : vector<8x256xf32>
    %c2_i32_39 = arith.constant 2 : i32
    %205 = tpu.dynamic_rotate %190 by %c2_i32_39 dim 0 : vector<8x256xf32>, i32 -> vector<8x256xf32>
    %206 = vector.extract_strided_slice %46 {offsets = [0, 31], sizes = [8, 1], strides = [1, 1]} : vector<8x36xf32> to vector<8x1xf32>
    %207 = vector.broadcast %206 : vector<8x1xf32> to vector<8x256xf32>
    %208 = arith.mulf %207, %205 : vector<8x256xf32>
    %209 = arith.addf %189, %208 : vector<8x256xf32>
    %c222_i32 = arith.constant 222 : i32
    %210 = tpu.dynamic_rotate %45 by %c222_i32 dim 1 : vector<8x256xf32>, i32 -> vector<8x256xf32>
    %211 = vector.extract_strided_slice %46 {offsets = [0, 32], sizes = [8, 1], strides = [1, 1]} : vector<8x36xf32> to vector<8x1xf32>
    %212 = vector.broadcast %211 : vector<8x1xf32> to vector<8x256xf32>
    %213 = arith.mulf %212, %210 : vector<8x256xf32>
    %214 = arith.addf %194, %213 : vector<8x256xf32>
    %c6_i32_40 = arith.constant 6 : i32
    %215 = tpu.dynamic_rotate %210 by %c6_i32_40 dim 0 : vector<8x256xf32>, i32 -> vector<8x256xf32>
    %216 = vector.extract_strided_slice %46 {offsets = [0, 33], sizes = [8, 1], strides = [1, 1]} : vector<8x36xf32> to vector<8x1xf32>
    %217 = vector.broadcast %216 : vector<8x1xf32> to vector<8x256xf32>
    %218 = arith.mulf %217, %215 : vector<8x256xf32>
    %219 = arith.addf %199, %218 : vector<8x256xf32>
    %c4_i32_41 = arith.constant 4 : i32
    %220 = tpu.dynamic_rotate %210 by %c4_i32_41 dim 0 : vector<8x256xf32>, i32 -> vector<8x256xf32>
    %221 = vector.extract_strided_slice %46 {offsets = [0, 34], sizes = [8, 1], strides = [1, 1]} : vector<8x36xf32> to vector<8x1xf32>
    %222 = vector.broadcast %221 : vector<8x1xf32> to vector<8x256xf32>
    %223 = arith.mulf %222, %220 : vector<8x256xf32>
    %224 = arith.addf %204, %223 : vector<8x256xf32>
    %c2_i32_42 = arith.constant 2 : i32
    %225 = tpu.dynamic_rotate %210 by %c2_i32_42 dim 0 : vector<8x256xf32>, i32 -> vector<8x256xf32>
    %226 = vector.extract_strided_slice %46 {offsets = [0, 35], sizes = [8, 1], strides = [1, 1]} : vector<8x36xf32> to vector<8x1xf32>
    %227 = vector.broadcast %226 : vector<8x1xf32> to vector<8x256xf32>
    %228 = arith.mulf %227, %225 : vector<8x256xf32>
    %229 = arith.addf %209, %228 : vector<8x256xf32>
    %230 = arith.addf %214, %219 : vector<8x256xf32>
    %231 = arith.addf %224, %229 : vector<8x256xf32>
    %232 = arith.addf %230, %231 : vector<8x256xf32>
    %c0_43 = arith.constant 0 : index
    %c0_44 = arith.constant 0 : index
    %233 = vector.load %arg1[%c0_43, %c0_44] : memref<8x1xf32, #tpu.memory_space<vmem>>, vector<8x1xf32>
    %234 = vector.broadcast %233 : vector<8x1xf32> to vector<8x256xf32>
    %235 = arith.addf %232, %234 : vector<8x256xf32>
    %236 = math.tanh %235 : vector<8x256xf32>
    %c0_45 = arith.constant 0 : index
    %c0_46 = arith.constant 0 : index
    %237 = vector.load %arg3[%c0_45, %c0_46] : memref<8x256xf32, #tpu.memory_space<vmem>>, vector<8x256xf32>
    tpu.vector_store %arg3[%c0_45, %c0_46], %236 {strides = array<i32>} : memref<8x256xf32, #tpu.memory_space<vmem>>, vector<8x256xf32>,
    return
  }
}

</mosaic_0001>

<bundles_post_ra>
// kernel: diffusion_block_apply.1
= control target key start
LH: loop header
LB: loop body
LE: loop exit
PB: predicated region body
PF: predicated region fallthrough
CT: control target
= control target key end

     0   :  { %v579_v2 = vmov 1   ;;  %v580_v8 = vmov 2   ;;  %v581_v9 = vmov 3   ;;  %v582_v10 = vmov 4   ;;  %s617_s18 = smov 94   ;;  %s618_s19 = smov 126   ;;  %s888_s0 = inlined_call_operand.vmem [shape: f32[8,256], index: 0, kind: input, shape index: {}]   ;;  %s889_s2 = inlined_call_operand.vmem [shape: f32[8,36], index: 2, kind: input, shape index: {}]   ;;  %s890_s1 = inlined_call_operand.vmem [shape: f32[8,1], index: 1, kind: input, shape index: {}]   ;;  %s891_s3 = inlined_call_operand.vmem [shape: f32[8,256], index: 3, kind: output, shape index: {}]  }
   0x1   :  { %v646_v0 = vld [vmem:[%s888_s0] sm:$0xff]  ;;  %v651_v1 = vld [vmem:[%s888_s0 + $0x8] sm:$0xff]  ;;  %536 = vset.pattern.permute.xlu1 %v579_v2  ;;  %v583_v11 = vmov 5   ;;  %v584_v12 = vmov 0   ;;  %v585_v13 = vmov 6   ;;  %v586_v14 = vmov 7  }
   0x2   :  { %v656_v3 = vld [vmem:[%s889_s2] sm:$0xff]  ;;  %v16_v4 = vadd.f32 %v651_v1, %v646_v0  ;;  %v19_v5 = vmul.f32 %v646_v0, %v646_v0  ;;  %v20_v6 = vmul.f32 %v651_v1, %v651_v1  ;;  %535 = vset.pattern.permute.xlu0 %v584_v12  ;;  %v587_v15 = vmov 9   ;;  %s615_s0 = smov 110   ;;  %s616_s2 = smov 127  }
   0x3   :  { %80 = vperm.xlu1 %536, %v656_v3   ;;  %v588_v16 = vmov 10   ;;  %v589_v17 = vmov 8   ;;  %v590_v18 = vmov 13   ;;  %v591_v19 = vmov 11   ;;  %s619_s22 = smov 112   ;;  %s620_s23 = smov 111  }
   0x4   :  { %17 = vadd.xlane.f32.xlu0 %v16_v4  ;;  %v21_v7 = vadd.f32 %v20_v6, %v19_v5  ;;  %v592_v20 = vmov 14   ;;  %v593_v21 = vmov 12   ;;  %v594_v22 = vmov 17   ;;  %s621_s24 = smov 96   ;;  %s622_s25 = smov 95  }
   0x5   :  { %v595_v23 = vmov 15   ;;  %v596_v24 = vmov 18   ;;  %v597_v25 = vmov 16   ;;  %v598_v26 = vmov 20  }
   0x6   :  { %v599_v27 = vmov 19   ;;  %v600_v28 = vmov 21   ;;  %v601_v29 = vmov 22   ;;  %v602_v30 = vmov 23  }
   0x7   :  { %537 = vset.pattern.permute.xlu1 %v580_v8  ;;  %v603_v31 = vmov 25   ;;  %v604_v32 = vmov 28   ;;  %v605_v33 = vmov 31   ;;  %v24_v34 = vlaneseq }
   0x8   :  { %90 = vperm.xlu1 %537, %v656_v3   ;;  %22 = vadd.xlane.f32.xlu0 %v21_v7  ;;  %v606_v48 = vmov 32   ;;  %v607_v54 = vmov 35   ;;  %v608_v55 = vmov 24   ;;  %v609_v56 = vmov 26  }
   0x9   :  { %v25_v35 = vshrl.u32 %v24_v34, 7  ;;  %v610_v57 = vmov 27   ;;  %v611_v58 = vmov 29   ;;  %v612_v59 = vmov 30  }
   0xa   :  { %v613_v61 = vmov 33   ;;  %v614_v63 = vmov 34  }
   0xb   :  { %v30_v36 = vand.u32 1, %v25_v35 }
   0xc   :  { %538 = vset.pattern.permute.xlu1 %v581_v9 }
   0xd   :  { %100 = vperm.xlu1 %538, %v656_v3   ;;  %vm38_vm0 = vcmp.ge.s32.totalorder %v30_v36, 1  ;;  %v776_v36 = vand.u32 127, %v24_v34 }
   0xf   :  { %vm113_vm1 = vcmp.lt.s32.totalorder %v776_v36, 127  ;;  %vm158_vm2 = vcmp.lt.s32.totalorder %v776_v36, 126  ;;  %vm203_vm3 = vcmp.lt.s32.totalorder %v776_v36, 112  ;;  %vm248_vm4 = vcmp.lt.s32.totalorder %v776_v36, 111 }
  0x10   :  { %vm293_vm5 = vcmp.lt.s32.totalorder %v776_v36, 110  ;;  %vm338_vm6 = vcmp.lt.s32.totalorder %v776_v36, 96  ;;  %vm383_vm7 = vcmp.lt.s32.totalorder %v776_v36, 95  ;;  %vm428_vm8 = vcmp.lt.s32.totalorder %v776_v36, 94 }
  0x11   :  { %539 = vset.pattern.permute.xlu1 %v582_v10 }
  0x12   :  { %117 = vperm.xlu1 %539, %v656_v3  }
  0x16   :  { %540 = vset.pattern.permute.xlu1 %v583_v11 }
  0x17   :  { %127 = vperm.xlu1 %540, %v656_v3  }
  0x1b   :  { %541 = vset.pattern.permute.xlu1 %v585_v13 }
  0x1c   :  { %137 = vperm.xlu1 %541, %v656_v3  }
  0x1e   :  { %70 = vperm.xlu0 %535, %v656_v3  }
  0x20   :  { %542 = vset.pattern.permute.xlu1 %v586_v14 }
  0x21   :  { %147 = vperm.xlu1 %542, %v656_v3  }
  0x22   :  { %543 = vset.pattern.permute.xlu0 %v589_v17 }
  0x23   :  { %162 = vperm.xlu0 %543, %v656_v3  }
  0x25   :  { %544 = vset.pattern.permute.xlu1 %v587_v15 }
  0x26   :  { %172 = vperm.xlu1 %544, %v656_v3  }
  0x27   :  { %546 = vset.pattern.permute.xlu0 %v591_v19 }
  0x28   :  { %192 = vperm.xlu0 %546, %v656_v3  }
  0x2a   :  { %545 = vset.pattern.permute.xlu1 %v588_v16 }
  0x2b   :  { %182 = vperm.xlu1 %545, %v656_v3  }
  0x2c   :  { %547 = vset.pattern.permute.xlu0 %v593_v21 }
  0x2d   :  { %207 = vperm.xlu0 %547, %v656_v3  }
  0x2f   :  { %548 = vset.pattern.permute.xlu1 %v590_v18 }
  0x30   :  { %217 = vperm.xlu1 %548, %v656_v3  }
  0x31   :  { %550 = vset.pattern.permute.xlu0 %v595_v23 }
  0x32   :  { %237 = vperm.xlu0 %550, %v656_v3  }
  0x34   :  { %549 = vset.pattern.permute.xlu1 %v592_v20 }
  0x35   :  { %227 = vperm.xlu1 %549, %v656_v3  }
  0x36   :  { %551 = vset.pattern.permute.xlu0 %v597_v25 }
  0x37   :  { %252 = vperm.xlu0 %551, %v656_v3  }
  0x39   :  { %552 = vset.pattern.permute.xlu1 %v594_v22 }
  0x3a   :  { %262 = vperm.xlu1 %552, %v656_v3  }
  0x3b   :  { %554 = vset.pattern.permute.xlu0 %v599_v27 }
  0x3c   :  { %282 = vperm.xlu0 %554, %v656_v3  }
  0x3e   :  { %553 = vset.pattern.permute.xlu1 %v596_v24 }
  0x3f   :  { %272 = vperm.xlu1 %553, %v656_v3  }
  0x40   :  { %557 = vset.pattern.permute.xlu0 %v601_v29 }
  0x41   :  { %317 = vperm.xlu0 %557, %v656_v3  }
  0x43   :  { %555 = vset.pattern.permute.xlu1 %v598_v26 }
  0x44   :  { %297 = vperm.xlu1 %555, %v656_v3  }
  0x45   :  { %561 = vset.pattern.permute.xlu0 %v603_v31 }
  0x46   :  { %352 = vperm.xlu0 %561, %v656_v3  }
  0x48   :  { %556 = vset.pattern.permute.xlu1 %v600_v28 }
  0x49   :  { %307 = vperm.xlu1 %556, %v656_v3  }
  0x4a   :  { %564 = vset.pattern.permute.xlu0 %v604_v32 }
  0x4b   :  { %387 = vperm.xlu0 %564, %v656_v3  }
  0x4d   :  { %558 = vset.pattern.permute.xlu1 %v602_v30 }
  0x4e   :  { %327 = vperm.xlu1 %558, %v656_v3  }
  0x4f   :  { %567 = vset.pattern.permute.xlu0 %v605_v33 }
  0x50   :  { %417 = vperm.xlu0 %567, %v656_v3  }
  0x52   :  { %559 = vset.pattern.permute.xlu1 %v584_v12 }
  0x54   :  { %568 = vset.pattern.permute.xlu0 %v606_v48 }
  0x55   :  { %432 = vperm.xlu0 %568, %v656_v3  }
  0x59   :  { %571 = vset.pattern.permute.xlu0 %v607_v54 }
  0x82   :  { %v700_v60 = vpop.permute.xlu1 %80 }
  0x87   :  { %v703_v62 = vpop.permute.xlu1 %90 }
  0x8c   :  { %v706_v2 = vpop.permute.xlu1 %100 }
  0x91   :  { %v18_v37 = vpop.xlane.xlu0 %17  ;;  %v708_v4 = vpop.permute.xlu1 %117 }
  0x92   :  { %v39_v38 = vrot.slane %v18_v37, 7  ;;  %v40_v39 = vrot.slane %v18_v37, 1 }
  0x94   :  { %v43_v40 = vsel %vm38_vm0, %v39_v38, %v40_v39 }
  0x95   :  { %v44_v41 = vadd.f32 %v43_v40, %v18_v37  ;;  %v23_v42 = vpop.xlane.xlu0 %22 }
  0x96   :  { %v41_v43 = vrot.slane %v23_v42, 7  ;;  %v42_v44 = vrot.slane %v23_v42, 1  ;;  %v710_v5 = vpop.permute.xlu1 %127 }
  0x97   :  { %v47_v45 = vmul.f32 0.001953125, %v44_v41 }
  0x98   :  { %v45_v46 = vsel %vm38_vm0, %v41_v43, %v42_v44 }
  0x99   :  { %v46_v47 = vadd.f32 %v45_v46, %v23_v42  ;;  %55 = vperm.xlu1 %559, %v47_v45   ;;  %v49_v50 = vmul.f32 %v47_v45, %v47_v45 }
  0x9b   :  { %v48_v49 = vmul.f32 0.001953125, %v46_v47  ;;  %v712_v6 = vpop.permute.xlu1 %137 }
  0x9d   :  { %v50_v51 = vsub.f32 %v48_v49, %v49_v50 }
  0x9f   :  { %v51_v52 = vadd.f32 1e-05, %v50_v51 }
  0xa0   :  { %v714_v7 = vpop.permute.xlu1 %147 }
  0xa1   :  { %573 = vrsqrt.f32 %v51_v52 }
  0xa5   :  { %v716_v8 = vpop.permute.xlu1 %172 }
  0xaa   :  { %v718_v9 = vpop.permute.xlu1 %182 }
  0xab   :  { %v574_v53 = vpop.eup %573 }
  0xac   :  { %62 = vperm.xlu1 %559, %v574_v53  }
  0xaf   :  { %v720_v10 = vpop.permute.xlu1 %217 }
  0xb0   :  { %560 = vset.pattern.permute.xlu1 %v608_v55 }
  0xb1   :  { %342 = vperm.xlu1 %560, %v656_v3  }
  0xb4   :  { %v722_v11 = vpop.permute.xlu1 %227 }
  0xb5   :  { %562 = vset.pattern.permute.xlu1 %v609_v56 }
  0xb6   :  { %362 = vperm.xlu1 %562, %v656_v3  }
  0xb9   :  { %v724_v13 = vpop.permute.xlu1 %262 }
  0xba   :  { %563 = vset.pattern.permute.xlu1 %v610_v57 }
  0xbb   :  { %372 = vperm.xlu1 %563, %v656_v3  }
  0xbe   :  { %v726_v14 = vpop.permute.xlu1 %272 }
  0xbf   :  { %565 = vset.pattern.permute.xlu1 %v611_v58 }
  0xc0   :  { %397 = vperm.xlu1 %565, %v656_v3  }
  0xc3   :  { %v728_v15 = vpop.permute.xlu1 %297 }
  0xc4   :  { %566 = vset.pattern.permute.xlu1 %v612_v59 }
  0xc5   :  { %407 = vperm.xlu1 %566, %v656_v3  }
  0xc8   :  { %v730_v16 = vpop.permute.xlu1 %307 }
  0xc9   :  { %569 = vset.pattern.permute.xlu1 %v613_v61 }
  0xca   :  { %442 = vperm.xlu1 %569, %v656_v3  }
  0xcd   :  { %v732_v17 = vpop.permute.xlu1 %327 }
  0xce   :  { %570 = vset.pattern.permute.xlu1 %v614_v63 }
  0xcf   :  { %452 = vperm.xlu1 %570, %v656_v3  }
 0x118   :  { %v56_v18 = vpop.permute.xlu1 %55 }
 0x119   :  { %v58_v19 = vsub.f32 %v646_v0, %v56_v18  ;;  %v59_v22 = vsub.f32 %v651_v1, %v56_v18  ;;  %v475_v0 = vld [vmem:[%s890_s1] sm:$0xff] }
 0x12b   :  { %v63_v20 = vpop.permute.xlu1 %62 }
 0x12c   :  { %v735_v21 = vmul.f32 %v63_v20, %v58_v19  ;;  %v66_v23 = vmul.f32 %v63_v20, %v59_v22 }
 0x12e   :  { %289 = vrot.lane.b32.xlu0 %v735_v21, %s615_s0  ;;  %107 = vrot.lane.b32.xlu1 %v735_v21, %s616_s2  ;;  %v77_v38 = vrot.slane %v735_v21, 2  ;;  %v78_v39 = vrot.slane %v66_v23, 2  ;;  %v87_v40 = vrot.slane %v735_v21, 4  ;;  %v88_v41 = vrot.slane %v66_v23, 4 }
 0x12f   :  { %v97_v42 = vrot.slane %v735_v21, 6  ;;  %v98_v43 = vrot.slane %v66_v23, 6 }
 0x130   :  { %v751_v1 = vpop.permute.xlu1 %342  ;;  %v83_v34 = vmul.f32 %v700_v60, %v77_v38  ;;  %v84_v47 = vmul.f32 %v700_v60, %v78_v39  ;;  %v93_v48 = vmul.f32 %v703_v62, %v87_v40  ;;  %v94_v49 = vmul.f32 %v703_v62, %v88_v41 }
 0x131   :  { %v103_v51 = vmul.f32 %v706_v2, %v97_v42  ;;  %v104_v52 = vmul.f32 %v706_v2, %v98_v43 }
 0x132   :  { %462 = vperm.xlu0 %571, %v656_v3   ;;  %109 = vrot.lane.b32.xlu1 %v66_v23, %s616_s2  ;;  %v71_v3 = vpop.permute.xlu0 %70 }
 0x133   :  { %v73_v44 = vmul.f32 %v71_v3, %v735_v21  ;;  %v74_v45 = vmul.f32 %v71_v3, %v66_v23 }
 0x136   :  { %424 = vrot.lane.b32.xlu0 %v735_v21, %s617_s18  ;;  %154 = vrot.lane.b32.xlu1 %v735_v21, %s618_s19  ;;  %v163_v24 = vpop.permute.xlu0 %162 }
 0x137   :  { %572 = vset.pattern.permute.xlu0 %v584_v12  ;;  %v753_v12 = vpop.permute.xlu1 %362 }
 0x13a   :  { %156 = vrot.lane.b32.xlu1 %v66_v23, %s618_s19  ;;  %478 = vperm.xlu0 %572, %v475_v0   ;;  %v757_v26 = vpop.permute.xlu0 %192 }
 0x13b   :  { %v755_v25 = vpop.permute.xlu1 %372 }
 0x13e   :  { %199 = vrot.lane.b32.xlu1 %v735_v21, %s619_s22  ;;  %v761_v28 = vpop.permute.xlu0 %207 }
 0x13f   :  { %v759_v27 = vpop.permute.xlu1 %397 }
 0x142   :  { %201 = vrot.lane.b32.xlu1 %v66_v23, %s619_s22  ;;  %v765_v30 = vpop.permute.xlu0 %237 }
 0x144   :  { %v763_v29 = vpop.permute.xlu1 %407 }
 0x146   :  { %244 = vrot.lane.b32.xlu1 %v735_v21, %s620_s23  ;;  %v769_v32 = vpop.permute.xlu0 %252 }
 0x149   :  { %v767_v31 = vpop.permute.xlu1 %442 }
 0x14a   :  { %246 = vrot.lane.b32.xlu1 %v66_v23, %s620_s23  ;;  %v773_v35 = vpop.permute.xlu0 %282 }
 0x14e   :  { %291 = vrot.lane.b32.xlu1 %v66_v23, %s615_s0  ;;  %v771_v33 = vpop.permute.xlu1 %452  ;;  %v783_v46 = vpop.permute.xlu0 %317 }
 0x152   :  { %334 = vrot.lane.b32.xlu1 %v735_v21, %s621_s24  ;;  %v795_v2 = vpop.permute.xlu0 %352 }
 0x156   :  { %336 = vrot.lane.b32.xlu1 %v66_v23, %s621_s24 }
 0x15a   :  { %379 = vrot.lane.b32.xlu1 %v735_v21, %s622_s25 }
 0x15e   :  { %381 = vrot.lane.b32.xlu1 %v66_v23, %s622_s25 }
 0x162   :  { %426 = vrot.lane.b32.xlu1 %v66_v23, %s617_s18 }
 0x1a0   :  { %v108_v37 = vpop.permute.xlu1 %107 }
 0x1a4   :  { %v110_v50 = vpop.permute.xlu1 %109 }
 0x1a5   :  { %v114_v53 = vsel %vm113_vm1, %v108_v37, %v110_v50  ;;  %v115_v54 = vsel %vm113_vm1, %v110_v50, %v108_v37 }
 0x1a6   :  { %v120_v55 = vmul.f32 %v708_v4, %v114_v53  ;;  %v121_v56 = vmul.f32 %v708_v4, %v115_v54  ;;  %v124_v57 = vrot.slane %v114_v53, 2  ;;  %v125_v58 = vrot.slane %v115_v54, 2 }
 0x1a7   :  { %v134_v59 = vrot.slane %v114_v53, 4  ;;  %v135_v61 = vrot.slane %v115_v54, 4  ;;  %v144_v60 = vrot.slane %v114_v53, 6  ;;  %v145_v63 = vrot.slane %v115_v54, 6 }
 0x1a8   :  { %v122_v18 = vadd.f32 %v120_v55, %v73_v44  ;;  %v123_v19 = vadd.f32 %v121_v56, %v74_v45  ;;  %v130_v62 = vmul.f32 %v710_v5, %v124_v57  ;;  %v131_v20 = vmul.f32 %v710_v5, %v125_v58  ;;  %v155_v21 = vpop.permute.xlu1 %154 }
 0x1a9   :  { %v140_v22 = vmul.f32 %v712_v6, %v134_v59  ;;  %v141_v23 = vmul.f32 %v712_v6, %v135_v61  ;;  %v150_v4 = vmul.f32 %v714_v7, %v144_v60  ;;  %v151_v0 = vmul.f32 %v714_v7, %v145_v63  ;;  %v802_v6 = vpop.permute.xlu0 %387 }
 0x1aa   :  { %v132_v3 = vadd.f32 %v130_v62, %v83_v34  ;;  %v133_v37 = vadd.f32 %v131_v20, %v84_v47 }
 0x1ab   :  { %v142_v38 = vadd.f32 %v140_v22, %v93_v48  ;;  %v143_v39 = vadd.f32 %v141_v23, %v94_v49  ;;  %v152_v40 = vadd.f32 %v150_v4, %v103_v51  ;;  %v153_v41 = vadd.f32 %v151_v0, %v104_v52 }
 0x1ac   :  { %v157_v5 = vpop.permute.xlu1 %156 }
 0x1ad   :  { %v159_v42 = vsel %vm158_vm2, %v155_v21, %v157_v5  ;;  %v160_v43 = vsel %vm158_vm2, %v157_v5, %v155_v21  ;;  %v811_v20 = vpop.permute.xlu0 %417 }
 0x1ae   :  { %v165_v44 = vmul.f32 %v163_v24, %v159_v42  ;;  %v166_v45 = vmul.f32 %v163_v24, %v160_v43  ;;  %v169_v50 = vrot.slane %v159_v42, 2  ;;  %v170_v53 = vrot.slane %v160_v43, 2 }
 0x1af   :  { %v179_v54 = vrot.slane %v159_v42, 4  ;;  %v180_v55 = vrot.slane %v160_v43, 4  ;;  %v189_v7 = vrot.slane %v159_v42, 6  ;;  %v190_v34 = vrot.slane %v160_v43, 6 }
 0x1b0   :  { %v167_v47 = vadd.f32 %v165_v44, %v122_v18  ;;  %v168_v56 = vadd.f32 %v166_v45, %v123_v19  ;;  %v175_v48 = vmul.f32 %v716_v8, %v169_v50  ;;  %v176_v49 = vmul.f32 %v716_v8, %v170_v53  ;;  %v200_v51 = vpop.permute.xlu1 %199 }
 0x1b1   :  { %v185_v52 = vmul.f32 %v718_v9, %v179_v54  ;;  %v186_v57 = vmul.f32 %v718_v9, %v180_v55  ;;  %v195_v24 = vmul.f32 %v757_v26, %v189_v7  ;;  %v196_v58 = vmul.f32 %v757_v26, %v190_v34  ;;  %v822_v53 = vpop.permute.xlu0 %432 }
 0x1b2   :  { %v177_v59 = vadd.f32 %v175_v48, %v132_v3  ;;  %v178_v61 = vadd.f32 %v176_v49, %v133_v37 }
 0x1b3   :  { %v187_v60 = vadd.f32 %v185_v52, %v142_v38  ;;  %v188_v63 = vadd.f32 %v186_v57, %v143_v39  ;;  %v197_v18 = vadd.f32 %v195_v24, %v152_v40  ;;  %v198_v19 = vadd.f32 %v196_v58, %v153_v41 }
 0x1b4   :  { %v202_v62 = vpop.permute.xlu1 %201 }
 0x1b5   :  { %v204_v8 = vsel %vm203_vm3, %v200_v51, %v202_v62  ;;  %v205_v21 = vsel %vm203_vm3, %v202_v62, %v200_v51 }
 0x1b6   :  { %v210_v22 = vmul.f32 %v761_v28, %v204_v8  ;;  %v211_v9 = vmul.f32 %v761_v28, %v205_v21  ;;  %v214_v23 = vrot.slane %v204_v8, 2  ;;  %v215_v4 = vrot.slane %v205_v21, 2 }
 0x1b7   :  { %v224_v26 = vrot.slane %v204_v8, 4  ;;  %v225_v0 = vrot.slane %v205_v21, 4  ;;  %v234_v3 = vrot.slane %v204_v8, 6  ;;  %v235_v37 = vrot.slane %v205_v21, 6 }
 0x1b8   :  { %v212_v5 = vadd.f32 %v210_v22, %v167_v47  ;;  %v213_v38 = vadd.f32 %v211_v9, %v168_v56  ;;  %v220_v39 = vmul.f32 %v720_v10, %v214_v23  ;;  %v221_v40 = vmul.f32 %v720_v10, %v215_v4  ;;  %v245_v41 = vpop.permute.xlu1 %244 }
 0x1b9   :  { %v230_v42 = vmul.f32 %v722_v11, %v224_v26  ;;  %v231_v43 = vmul.f32 %v722_v11, %v225_v0  ;;  %v240_v44 = vmul.f32 %v765_v30, %v234_v3  ;;  %v241_v28 = vmul.f32 %v765_v30, %v235_v37 }
 0x1ba   :  { %v222_v45 = vadd.f32 %v220_v39, %v177_v59  ;;  %v223_v50 = vadd.f32 %v221_v40, %v178_v61 }
 0x1bb   :  { %v232_v54 = vadd.f32 %v230_v42, %v187_v60  ;;  %v233_v55 = vadd.f32 %v231_v43, %v188_v63  ;;  %v242_v7 = vadd.f32 %v240_v44, %v197_v18  ;;  %v243_v34 = vadd.f32 %v241_v28, %v198_v19  ;;  %v290_v18 = vpop.permute.xlu0 %289 }
 0x1bc   :  { %v247_v10 = vpop.permute.xlu1 %246 }
 0x1bd   :  { %v249_v47 = vsel %vm248_vm4, %v245_v41, %v247_v10  ;;  %v250_v56 = vsel %vm248_vm4, %v247_v10, %v245_v41 }
 0x1be   :  { %v255_v11 = vmul.f32 %v769_v32, %v249_v47  ;;  %v256_v48 = vmul.f32 %v769_v32, %v250_v56  ;;  %v259_v30 = vrot.slane %v249_v47, 2  ;;  %v260_v49 = vrot.slane %v250_v56, 2 }
 0x1bf   :  { %v269_v51 = vrot.slane %v249_v47, 4  ;;  %v270_v52 = vrot.slane %v250_v56, 4  ;;  %v279_v57 = vrot.slane %v249_v47, 6  ;;  %v280_v24 = vrot.slane %v250_v56, 6 }
 0x1c0   :  { %v257_v58 = vadd.f32 %v255_v11, %v212_v5  ;;  %v258_v59 = vadd.f32 %v256_v48, %v213_v38  ;;  %v265_v61 = vmul.f32 %v724_v13, %v259_v30  ;;  %v266_v60 = vmul.f32 %v724_v13, %v260_v49  ;;  %v292_v63 = vpop.permute.xlu1 %291 }
 0x1c1   :  { %v275_v19 = vmul.f32 %v726_v14, %v269_v51  ;;  %v276_v32 = vmul.f32 %v726_v14, %v270_v52  ;;  %v285_v62 = vmul.f32 %v773_v35, %v279_v57  ;;  %v286_v8 = vmul.f32 %v773_v35, %v280_v24 }
 0x1c2   :  { %v267_v21 = vadd.f32 %v265_v61, %v222_v45  ;;  %v268_v22 = vadd.f32 %v266_v60, %v223_v50  ;;  %v294_v9 = vsel %vm293_vm5, %v290_v18, %v292_v63  ;;  %v295_v23 = vsel %vm293_vm5, %v292_v63, %v290_v18 }
 0x1c3   :  { %v277_v4 = vadd.f32 %v275_v19, %v232_v54  ;;  %v278_v13 = vadd.f32 %v276_v32, %v233_v55  ;;  %v287_v26 = vadd.f32 %v285_v62, %v242_v7  ;;  %v288_v0 = vadd.f32 %v286_v8, %v243_v34  ;;  %v463_v62 = vpop.permute.xlu0 %462 }
 0x1c4   :  { %v300_v3 = vmul.f32 %v728_v15, %v294_v9  ;;  %v301_v14 = vmul.f32 %v728_v15, %v295_v23  ;;  %v304_v37 = vrot.slane %v294_v9, 2  ;;  %v305_v5 = vrot.slane %v295_v23, 2  ;;  %v335_v38 = vpop.permute.xlu1 %334 }
 0x1c5   :  { %v314_v35 = vrot.slane %v294_v9, 4  ;;  %v315_v39 = vrot.slane %v295_v23, 4  ;;  %v324_v40 = vrot.slane %v294_v9, 6  ;;  %v325_v41 = vrot.slane %v295_v23, 6 }
 0x1c6   :  { %v302_v42 = vadd.f32 %v300_v3, %v257_v58  ;;  %v303_v43 = vadd.f32 %v301_v14, %v258_v59  ;;  %v310_v44 = vmul.f32 %v730_v16, %v304_v37  ;;  %v311_v28 = vmul.f32 %v730_v16, %v305_v5 }
 0x1c7   :  { %v320_v45 = vmul.f32 %v783_v46, %v314_v35  ;;  %v321_v50 = vmul.f32 %v783_v46, %v315_v39  ;;  %v330_v54 = vmul.f32 %v732_v17, %v324_v40  ;;  %v331_v15 = vmul.f32 %v732_v17, %v325_v41 }
 0x1c8   :  { %v312_v55 = vadd.f32 %v310_v44, %v267_v21  ;;  %v313_v7 = vadd.f32 %v311_v28, %v268_v22  ;;  %v337_v34 = vpop.permute.xlu1 %336 }
 0x1c9   :  { %v322_v10 = vadd.f32 %v320_v45, %v277_v4  ;;  %v323_v47 = vadd.f32 %v321_v50, %v278_v13  ;;  %v332_v56 = vadd.f32 %v330_v54, %v287_v26  ;;  %v333_v11 = vadd.f32 %v331_v15, %v288_v0 }
 0x1ca   :  { %v339_v48 = vsel %vm338_vm6, %v335_v38, %v337_v34  ;;  %v340_v16 = vsel %vm338_vm6, %v337_v34, %v335_v38 }
 0x1cb   :  { %v345_v46 = vmul.f32 %v751_v1, %v339_v48  ;;  %v346_v30 = vmul.f32 %v751_v1, %v340_v16  ;;  %v349_v17 = vrot.slane %v339_v48, 2  ;;  %v350_v49 = vrot.slane %v340_v16, 2 }
 0x1cc   :  { %v359_v51 = vrot.slane %v339_v48, 4  ;;  %v360_v52 = vrot.slane %v340_v16, 4  ;;  %v369_v57 = vrot.slane %v339_v48, 6  ;;  %v370_v24 = vrot.slane %v340_v16, 6  ;;  %v380_v58 = vpop.permute.xlu1 %379 }
 0x1cd   :  { %v347_v59 = vadd.f32 %v345_v46, %v302_v42  ;;  %v348_v61 = vadd.f32 %v346_v30, %v303_v43  ;;  %v355_v60 = vmul.f32 %v795_v2, %v349_v17  ;;  %v356_v63 = vmul.f32 %v795_v2, %v350_v49  ;;  %v425_v43 = vpop.permute.xlu0 %424 }
 0x1ce   :  { %v365_v18 = vmul.f32 %v753_v12, %v359_v51  ;;  %v366_v19 = vmul.f32 %v753_v12, %v360_v52  ;;  %v375_v32 = vmul.f32 %v755_v25, %v369_v57  ;;  %v376_v1 = vmul.f32 %v755_v25, %v370_v24 }
 0x1cf   :  { %v357_v8 = vadd.f32 %v355_v60, %v312_v55  ;;  %v358_v21 = vadd.f32 %v356_v63, %v313_v7 }
 0x1d0   :  { %v367_v22 = vadd.f32 %v365_v18, %v322_v10  ;;  %v368_v9 = vadd.f32 %v366_v19, %v323_v47  ;;  %v377_v23 = vadd.f32 %v375_v32, %v332_v56  ;;  %v378_v4 = vadd.f32 %v376_v1, %v333_v11  ;;  %v382_v13 = vpop.permute.xlu1 %381 }
 0x1d1   :  { %v384_v26 = vsel %vm383_vm7, %v380_v58, %v382_v13  ;;  %v385_v2 = vsel %vm383_vm7, %v382_v13, %v380_v58  ;;  %v479_v1 = vpop.permute.xlu0 %478 }
 0x1d2   :  { %v390_v12 = vmul.f32 %v802_v6, %v384_v26  ;;  %v391_v25 = vmul.f32 %v802_v6, %v385_v2  ;;  %v394_v0 = vrot.slane %v384_v26, 2  ;;  %v395_v3 = vrot.slane %v385_v2, 2 }
 0x1d3   :  { %v404_v14 = vrot.slane %v384_v26, 4  ;;  %v405_v37 = vrot.slane %v385_v2, 4  ;;  %v414_v5 = vrot.slane %v384_v26, 6  ;;  %v415_v38 = vrot.slane %v385_v2, 6 }
 0x1d4   :  { %v392_v35 = vadd.f32 %v390_v12, %v347_v59  ;;  %v393_v39 = vadd.f32 %v391_v25, %v348_v61  ;;  %v400_v40 = vmul.f32 %v759_v27, %v394_v0  ;;  %v401_v41 = vmul.f32 %v759_v27, %v395_v3  ;;  %v427_v42 = vpop.permute.xlu1 %426 }
 0x1d5   :  { %v410_v44 = vmul.f32 %v763_v29, %v404_v14  ;;  %v411_v28 = vmul.f32 %v763_v29, %v405_v37  ;;  %v420_v6 = vmul.f32 %v811_v20, %v414_v5  ;;  %v421_v45 = vmul.f32 %v811_v20, %v415_v38 }
 0x1d6   :  { %v429_v50 = vsel %vm428_vm8, %v425_v43, %v427_v42  ;;  %v430_v54 = vsel %vm428_vm8, %v427_v42, %v425_v43  ;;  %v402_v15 = vadd.f32 %v400_v40, %v357_v8  ;;  %v403_v55 = vadd.f32 %v401_v41, %v358_v21 }
 0x1d7   :  { %v435_v27 = vmul.f32 %v822_v53, %v429_v50  ;;  %v436_v7 = vmul.f32 %v822_v53, %v430_v54  ;;  %v439_v34 = vrot.slane %v429_v50, 2  ;;  %v440_v10 = vrot.slane %v430_v54, 2 }
 0x1d8   :  { %v449_v47 = vrot.slane %v429_v50, 4  ;;  %v450_v29 = vrot.slane %v430_v54, 4  ;;  %v459_v56 = vrot.slane %v429_v50, 6  ;;  %v460_v11 = vrot.slane %v430_v54, 6 }
 0x1d9   :  { %v445_v20 = vmul.f32 %v767_v31, %v439_v34  ;;  %v446_v48 = vmul.f32 %v767_v31, %v440_v10  ;;  %v412_v16 = vadd.f32 %v410_v44, %v367_v22  ;;  %v413_v46 = vadd.f32 %v411_v28, %v368_v9 }
 0x1da   :  { %v455_v36 = vmul.f32 %v771_v33, %v449_v47  ;;  %v456_v30 = vmul.f32 %v771_v33, %v450_v29  ;;  %v465_v17 = vmul.f32 %v463_v62, %v459_v56  ;;  %v466_v49 = vmul.f32 %v463_v62, %v460_v11 }
 0x1db   :  { %v422_v51 = vadd.f32 %v420_v6, %v377_v23  ;;  %v423_v53 = vadd.f32 %v421_v45, %v378_v4  ;;  %v437_v52 = vadd.f32 %v435_v27, %v392_v35  ;;  %v438_v57 = vadd.f32 %v436_v7, %v393_v39 }
 0x1dc   :  { %v447_v24 = vadd.f32 %v445_v20, %v402_v15  ;;  %v448_v58 = vadd.f32 %v446_v48, %v403_v55  ;;  %v457_v59 = vadd.f32 %v455_v36, %v412_v16  ;;  %v458_v61 = vadd.f32 %v456_v30, %v413_v46 }
 0x1dd   :  { %v467_v60 = vadd.f32 %v465_v17, %v422_v51  ;;  %v468_v63 = vadd.f32 %v466_v49, %v423_v53 }
 0x1de   :  { %v469_v18 = vadd.f32 %v447_v24, %v437_v52  ;;  %v470_v31 = vadd.f32 %v448_v58, %v438_v57 }
 0x1df   :  { %v471_v19 = vadd.f32 %v467_v60, %v457_v59  ;;  %v472_v32 = vadd.f32 %v468_v63, %v458_v61 }
 0x1e1   :  { %v473_v8 = vadd.f32 %v471_v19, %v469_v18  ;;  %v474_v21 = vadd.f32 %v472_v32, %v470_v31 }
 0x1e3   :  { %v481_v33 = vadd.f32 %v479_v1, %v473_v8  ;;  %v482_v22 = vadd.f32 %v479_v1, %v474_v21 }
 0x1e5   :  { %575 = vtanh.f32 %v481_v33 }
 0x1e6   :  { %577 = vtanh.f32 %v482_v22 }
 0x1ef   :  { %v576_v62 = vpop.eup %575 }
 0x1f0   :  { %v578_v9 = vpop.eup %577  ;;  %485 = vst [vmem:[%s891_s3] sm:$0xff] %v576_v62 }
 0x1f1   :  { %486 = vst [vmem:[%s891_s3 + $0x8] sm:$0xff] %v578_v9 }

</bundles_post_ra>
